<compile_context>
chip_gen: v5e
topology: v5e:2x2
jax: 0.10.0
libtpu: 0.0.40
codegen_flags: <defaults>
</compile_context>

<pallas_src>
import functools
import math

import jax
import jax.numpy as jnp
from jax.experimental import pallas as pl
from jax.experimental.pallas import tpu as pltpu


def _cross_attention_kernel(x_ref, y_ref,
                            wq_ref, bq_ref,
                            wkv_ref, bkv_ref,
                            wo_ref, bo_ref,
                            o_ref,
                            q_scr, kv_cache, attn_scr,
                            *, n_heads, d_head, d_embed, matmul_dtype):
    qi = pl.program_id(1)

    # ---- Fused K|V projection: once per batch element, cached in VMEM -------
    @pl.when(qi == 0)
    def _():
        yf = y_ref[...].astype(matmul_dtype)                       # (Lkv, d_cross)
        kv = jnp.dot(yf, wkv_ref[...],
                     preferred_element_type=jnp.float32) + bkv_ref[...]
        kv_cache[...] = kv.astype(kv_cache.dtype)                  # (Lkv, 2*d_embed)

    # ---- Q projection (softmax scale already folded into WqT / bq) ----------
    xf = x_ref[...].astype(matmul_dtype)                           # (TLQ, d_embed)
    q = jnp.dot(xf, wq_ref[...],
                preferred_element_type=jnp.float32) + bq_ref[...]
    q_scr[...] = q.astype(q_scr.dtype)

    # ---- Per-head attention: ref-sliced operands, direct scratch writes -----
    for h in range(n_heads):
        ksl = slice(h * d_head, (h + 1) * d_head)
        vsl = slice(d_embed + h * d_head, d_embed + (h + 1) * d_head)
        qh = q_scr[:, ksl]                                         # (TLQ, Dh)
        kh = kv_cache[:, ksl]                                      # (Lkv, Dh)
        vh = kv_cache[:, vsl]                                      # (Lkv, Dh)
        s = jax.lax.dot_general(qh, kh, (((1,), (1,)), ((), ())),
                                preferred_element_type=jnp.float32)  # (TLQ, Lkv)
        s = s - jnp.max(s, axis=-1, keepdims=True)
        p = jnp.exp(s)
        p = p * pl.reciprocal(jnp.sum(p, axis=-1, keepdims=True), approx=True)
        oh = jnp.dot(p.astype(matmul_dtype), vh,
                     preferred_element_type=jnp.float32)           # (TLQ, Dh)
        attn_scr[:, ksl] = oh.astype(attn_scr.dtype)

    # ---- Output projection ---------------------------------------------------
    out = (jnp.dot(attn_scr[...], wo_ref[...],
                   preferred_element_type=jnp.float32) + bo_ref[...])
    o_ref[...] = out.astype(o_ref.dtype)


def _pick_q_tile(lq, cap):
    """Largest divisor of lq that is <= cap and a multiple of 8 (8,128 rule)."""
    if lq <= cap:
        return lq
    for t in range(cap, 7, -1):
        if lq % t == 0 and t % 8 == 0:
            return t
    # Awkward Lq with no multiple-of-8 divisor <= cap: fall back to a single
    # full query tile (may enlarge the x/out blocks for very long sequences).
    return lq


def cross_attention(x, y, params, n_heads, *, q_tile_cap=256, matmul_dtype=None):
    """x: (B, Lq, d_embed), y: (B, Lkv, d_cross) -> (B, Lq, d_embed)."""
    wq, bq, wk, bk, wv, bv, wo, bo = params
    B, Lq, d_embed = x.shape
    By, Lkv, d_cross = y.shape
    assert By == B and d_embed % n_heads == 0
    d_head = d_embed // n_heads

    if matmul_dtype is None:
        # Follow the input dtype; pass matmul_dtype=jnp.bfloat16 explicitly for
        # ~2x projection-matmul throughput with f32 inputs (inference).
        matmul_dtype = jnp.bfloat16 if x.dtype == jnp.bfloat16 else jnp.float32
    matmul_dtype = jnp.dtype(matmul_dtype)

    # ---- Host-side weight prep (once) ---------------------------------------
    # nn.Linear stores (out, in); the kernel consumes (in, out). Fold the
    # softmax scale into the Q projection; fuse K|V weights and biases.
    scale = 1.0 / math.sqrt(d_head)
    wqT = (wq.T.astype(jnp.float32) * scale).astype(matmul_dtype)
    bq2 = (bq.astype(jnp.float32) * scale).reshape(1, d_embed)
    wkvT = jnp.concatenate([wk.T, wv.T], axis=1).astype(matmul_dtype)   # (d_cross, 2*d_embed)
    bkv2 = jnp.concatenate([bk, bv]).astype(jnp.float32).reshape(1, 2 * d_embed)
    woT = wo.T.astype(matmul_dtype)
    bo2 = bo.astype(jnp.float32).reshape(1, d_embed)

    # ---- Tiling: one batch element per step (>=2 parallel iterations), up to
    # q_tile_cap query rows per step ------------------------------------------
    TLQ = _pick_q_tile(Lq, q_tile_cap)
    grid = (B, Lq // TLQ)

    # ---- Right-size the VMEM limit from the real footprint + margin ---------
    in_item = jnp.dtype(x.dtype).itemsize
    mm_item = matmul_dtype.itemsize
    block_bytes = (TLQ * d_embed * in_item                  # x block
                   + Lkv * d_cross * jnp.dtype(y.dtype).itemsize
                   + TLQ * d_embed * in_item)               # out block
    weight_bytes = ((2 * d_embed * d_embed + d_cross * 2 * d_embed) * mm_item
                    + 4 * d_embed * 4)                      # f32 biases
    scratch_bytes = (2 * TLQ * d_embed + 2 * Lkv * d_embed) * mm_item
    est = 2 * (block_bytes + weight_bytes) + scratch_bytes  # double-buffered blocks
    vmem_limit = int(min(56 << 20, max(32 << 20, 2 * est + (8 << 20))))

    kernel = functools.partial(
        _cross_attention_kernel,
        n_heads=n_heads, d_head=d_head, d_embed=d_embed,
        matmul_dtype=matmul_dtype)

    def const_spec(shape):
        # Constant index_map -> fetched once and resident across the grid.
        return pl.BlockSpec(shape, lambda b, qi: tuple(0 for _ in shape))

    return pl.pallas_call(
        kernel,
        out_shape=jax.ShapeDtypeStruct((B, Lq, d_embed), x.dtype),
        grid_spec=pltpu.PrefetchScalarGridSpec(
            num_scalar_prefetch=0,
            grid=grid,
            in_specs=[
                pl.BlockSpec((None, TLQ, d_embed), lambda b, qi: (b, qi, 0)),  # x
                pl.BlockSpec((None, Lkv, d_cross), lambda b, qi: (b, 0, 0)),   # y
                const_spec((d_embed, d_embed)),        # WqT (scale folded)
                const_spec((1, d_embed)),              # bq  (scale folded)
                const_spec((d_cross, 2 * d_embed)),    # Wk|Wv fused
                const_spec((1, 2 * d_embed)),          # bk|bv fused
                const_spec((d_embed, d_embed)),        # WoT
                const_spec((1, d_embed)),              # bo
            ],
            out_specs=pl.BlockSpec((None, TLQ, d_embed),
                                   lambda b, qi: (b, qi, 0)),
            scratch_shapes=[
                pltpu.VMEM((TLQ, d_embed), matmul_dtype),        # Q tile
                pltpu.VMEM((Lkv, 2 * d_embed), matmul_dtype),    # fused K|V cache
                pltpu.VMEM((TLQ, d_embed), matmul_dtype),        # attention output
            ],
        ),
        compiler_params=pltpu.CompilerParams(
            # Batch elements are independent (megacore / v7x 2-TC sharding);
            # query tiles reuse the per-batch K|V scratch -> "arbitrary".
            dimension_semantics=("parallel", "arbitrary"),
            vmem_limit_bytes=vmem_limit,
        ),
    )(x, y, wqT, bq2, wkvT, bkv2, woT, bo2)


def _reference(x, y, params, n_heads):
    """Pure-JAX reference mirroring the PyTorch forward."""
    wq, bq, wk, bk, wv, bv, wo, bo = params
    B, Lq, d_embed = x.shape
    d_head = d_embed // n_heads
    q = x @ wq.T + bq
    k = y @ wk.T + bk
    v = y @ wv.T + bv
    q = q.reshape(B, -1, n_heads, d_head).transpose(0, 2, 1, 3)
    k = k.reshape(B, -1, n_heads, d_head).transpose(0, 2, 1, 3)
    v = v.reshape(B, -1, n_heads, d_head).transpose(0, 2, 1, 3)
    w = (q @ jnp.swapaxes(k, -1, -2)) / math.sqrt(d_head)
    w = jax.nn.softmax(w, axis=-1)
    o = w @ v
    o = o.transpose(0, 2, 1, 3).reshape(B, Lq, d_embed)
    return o @ wo.T + bo


if __name__ == "__main__":
    # Small shapes consistent with CrossAttention(n_heads=4, d_embed=32, d_cross=16)
    B, Lq, Lkv = 2, 8, 8
    n_heads, d_embed, d_cross = 4, 32, 16

    key = jax.random.PRNGKey(0)
    ks = jax.random.split(key, 10)
    x = jax.random.normal(ks[0], (B, Lq, d_embed), dtype=jnp.float32)
    y = jax.random.normal(ks[1], (B, Lkv, d_cross), dtype=jnp.float32)

    # Deterministic parameter init (nn.Linear weight shape = (out, in))
    scale_e = 1.0 / math.sqrt(d_embed)
    scale_c = 1.0 / math.sqrt(d_cross)
    wq = jax.random.uniform(ks[2], (d_embed, d_embed), jnp.float32, -scale_e, scale_e)
    bq = jax.random.uniform(ks[3], (d_embed,), jnp.float32, -scale_e, scale_e)
    wk = jax.random.uniform(ks[4], (d_embed, d_cross), jnp.float32, -scale_c, scale_c)
    bk = jax.random.uniform(ks[5], (d_embed,), jnp.float32, -scale_c, scale_c)
    wv = jax.random.uniform(ks[6], (d_embed, d_cross), jnp.float32, -scale_c, scale_c)
    bv = jax.random.uniform(ks[7], (d_embed,), jnp.float32, -scale_c, scale_c)
    wo = jax.random.uniform(ks[8], (d_embed, d_embed), jnp.float32, -scale_e, scale_e)
    bo = jax.random.uniform(ks[9], (d_embed,), jnp.float32, -scale_e, scale_e)
    params = (wq, bq, wk, bk, wv, bv, wo, bo)

    out = cross_attention(x, y, params, n_heads)
    out = jax.block_until_ready(out)

    ref = _reference(x, y, params, n_heads)
    assert out.shape == (B, Lq, d_embed)
    # Slightly looser than exact-f32 tolerance: the softmax normalisation uses
    # the EUP approximate reciprocal (pl.reciprocal(..., approx=True)).
    assert jnp.allclose(out, ref, atol=2e-3, rtol=2e-3), "mismatch vs reference"

    print("KERNEL_OK")
</pallas_src>

<mosaic_0001>
module attributes {stable_mosaic.version = 11 : i64} {
  func.func @_cross_attention_kernel(%arg0: i32, %arg1: i32, %arg2: memref<1x8x32xf32, #tpu.memory_space<vmem>>, %arg3: memref<1x8x16xf32, #tpu.memory_space<vmem>>, %arg4: memref<32x32xf32, #tpu.memory_space<vmem>>, %arg5: memref<1x32xf32, #tpu.memory_space<vmem>>, %arg6: memref<16x64xf32, #tpu.memory_space<vmem>>, %arg7: memref<1x64xf32, #tpu.memory_space<vmem>>, %arg8: memref<32x32xf32, #tpu.memory_space<vmem>>, %arg9: memref<1x32xf32, #tpu.memory_space<vmem>>, %arg10: memref<1x8x32xf32, #tpu.memory_space<vmem>>, %arg11: memref<8x32xf32, #tpu.memory_space<vmem>>, %arg12: memref<8x64xf32, #tpu.memory_space<vmem>>, %arg13: memref<8x32xf32, #tpu.memory_space<vmem>>) attributes {dimension_semantics = [#tpu.dimension_semantics<parallel>, #tpu.dimension_semantics<arbitrary>], iteration_bounds = array<i64: 2, 1>, scalar_prefetch = 0 : i64, scratch_operands = 3 : i64, tpu.core_type = #tpu.core_type<tc>, window_params = [{transform_indices = @transform_0, window_bounds = array<i64: 1, 8, 32>}, {transform_indices = @transform_1, window_bounds = array<i64: 1, 8, 16>}, {pipeline_mode = #tpu.pipeline_mode<synchronous>, transform_indices = @transform_2, window_bounds = array<i64: 32, 32>}, {pipeline_mode = #tpu.pipeline_mode<synchronous>, transform_indices = @transform_3, window_bounds = array<i64: 1, 32>}, {pipeline_mode = #tpu.pipeline_mode<synchronous>, transform_indices = @transform_4, window_bounds = array<i64: 16, 64>}, {pipeline_mode = #tpu.pipeline_mode<synchronous>, transform_indices = @transform_5, window_bounds = array<i64: 1, 64>}, {pipeline_mode = #tpu.pipeline_mode<synchronous>, transform_indices = @transform_6, window_bounds = array<i64: 32, 32>}, {pipeline_mode = #tpu.pipeline_mode<synchronous>, transform_indices = @transform_7, window_bounds = array<i64: 1, 32>}, {transform_indices = @transform_8, window_bounds = array<i64: 1, 8, 32>}]} {
    %c0_i32 = arith.constant 0 : i32
    %0 = arith.cmpi eq, %arg1, %c0_i32 : i32
    %1 = arith.extui %0 : i1 to i32
    %c0_i32_0 = arith.constant 0 : i32
    %2 = arith.cmpi ne, %1, %c0_i32_0 : i32
    scf.if %2 {
      %c0_60 = arith.constant 0 : index
      %c0_61 = arith.constant 0 : index
      %c0_62 = arith.constant 0 : index
      %84 = vector.load %arg3[%c0_60, %c0_61, %c0_62] : memref<1x8x16xf32, #tpu.memory_space<vmem>>, vector<1x8x16xf32>
      %85 = vector.shape_cast %84 : vector<1x8x16xf32> to vector<8x16xf32>
      %c0_63 = arith.constant 0 : index
      %c0_64 = arith.constant 0 : index
      %86 = vector.load %arg6[%c0_63, %c0_64] : memref<16x64xf32, #tpu.memory_space<vmem>>, vector<16x64xf32>
      %cst_65 = arith.constant dense<0.000000e+00> : vector<8x64xf32>
      %87 = tpu.matmul %85, %86, %cst_65 {dimension_numbers = #tpu.dot_dimension_numbers<[1], [0], [0], [1], [0, 0, 1, 1], [], []>} : vector<8x16xf32>, vector<16x64xf32>, vector<8x64xf32> -> vector<8x64xf32>
      %c0_66 = arith.constant 0 : index
      %c0_67 = arith.constant 0 : index
      %88 = vector.load %arg7[%c0_66, %c0_67] : memref<1x64xf32, #tpu.memory_space<vmem>>, vector<1x64xf32>
      %89 = vector.broadcast %88 : vector<1x64xf32> to vector<8x64xf32>
      %90 = arith.addf %87, %89 : vector<8x64xf32>
      %c0_68 = arith.constant 0 : index
      %c0_69 = arith.constant 0 : index
      %91 = vector.load %arg12[%c0_68, %c0_69] : memref<8x64xf32, #tpu.memory_space<vmem>>, vector<8x64xf32>
      tpu.vector_store %arg12[%c0_68, %c0_69], %90 {strides = array<i32>} : memref<8x64xf32, #tpu.memory_space<vmem>>, vector<8x64xf32>,
    } else {
    }
    %c0 = arith.constant 0 : index
    %c0_1 = arith.constant 0 : index
    %c0_2 = arith.constant 0 : index
    %3 = vector.load %arg2[%c0, %c0_1, %c0_2] : memref<1x8x32xf32, #tpu.memory_space<vmem>>, vector<1x8x32xf32>
    %4 = vector.shape_cast %3 : vector<1x8x32xf32> to vector<8x32xf32>
    %c0_3 = arith.constant 0 : index
    %c0_4 = arith.constant 0 : index
    %5 = vector.load %arg4[%c0_3, %c0_4] : memref<32x32xf32, #tpu.memory_space<vmem>>, vector<32x32xf32>
    %cst = arith.constant dense<0.000000e+00> : vector<8x32xf32>
    %6 = tpu.matmul %4, %5, %cst {dimension_numbers = #tpu.dot_dimension_numbers<[1], [0], [0], [1], [0, 0, 1, 1], [], []>} : vector<8x32xf32>, vector<32x32xf32>, vector<8x32xf32> -> vector<8x32xf32>
    %c0_5 = arith.constant 0 : index
    %c0_6 = arith.constant 0 : index
    %7 = vector.load %arg5[%c0_5, %c0_6] : memref<1x32xf32, #tpu.memory_space<vmem>>, vector<1x32xf32>
    %8 = vector.broadcast %7 : vector<1x32xf32> to vector<8x32xf32>
    %9 = arith.addf %6, %8 : vector<8x32xf32>
    %c0_7 = arith.constant 0 : index
    %c0_8 = arith.constant 0 : index
    %10 = vector.load %arg11[%c0_7, %c0_8] : memref<8x32xf32, #tpu.memory_space<vmem>>, vector<8x32xf32>
    tpu.vector_store %arg11[%c0_7, %c0_8], %9 {strides = array<i32>} : memref<8x32xf32, #tpu.memory_space<vmem>>, vector<8x32xf32>,
    %c0_9 = arith.constant 0 : index
    %c0_10 = arith.constant 0 : index
    %11 = vector.load %arg11[%c0_9, %c0_10] : memref<8x32xf32, #tpu.memory_space<vmem>>, vector<8x8xf32>
    %c0_11 = arith.constant 0 : index
    %c0_12 = arith.constant 0 : index
    %12 = vector.load %arg12[%c0_11, %c0_12] : memref<8x64xf32, #tpu.memory_space<vmem>>, vector<8x8xf32>
    %c0_13 = arith.constant 0 : index
    %c32 = arith.constant 32 : index
    %13 = vector.load %arg12[%c0_13, %c32] : memref<8x64xf32, #tpu.memory_space<vmem>>, vector<8x8xf32>
    %cst_14 = arith.constant dense<0.000000e+00> : vector<8x8xf32>
    %14 = tpu.matmul %11, %12, %cst_14 {dimension_numbers = #tpu.dot_dimension_numbers<[1], [1], [0], [0], [0, 0, 1, 0], [], []>} : vector<8x8xf32>, vector<8x8xf32>, vector<8x8xf32> -> vector<8x8xf32>
    %cst_15 = arith.constant dense<0xFF800000> : vector<8xf32>
    %15 = vector.multi_reduction <maximumf>, %14, %cst_15 [1] : vector<8x8xf32> to vector<8xf32>
    %16 = vector.shape_cast %15 : vector<8xf32> to vector<8x1xf32>
    %17 = vector.broadcast %16 : vector<8x1xf32> to vector<8x8xf32>
    %18 = arith.subf %14, %17 : vector<8x8xf32>
    %19 = math.exp %18 : vector<8x8xf32>
    %cst_16 = arith.constant dense<0.000000e+00> : vector<8xf32>
    %20 = vector.multi_reduction <add>, %19, %cst_16 [1] : vector<8x8xf32> to vector<8xf32>
    %21 = vector.shape_cast %20 : vector<8xf32> to vector<8x1xf32>
    %22 = tpu.reciprocal %21 {approx = true} : vector<8x1xf32> -> vector<8x1xf32>
    %23 = vector.broadcast %22 : vector<8x1xf32> to vector<8x8xf32>
    %24 = arith.mulf %19, %23 : vector<8x8xf32>
    %cst_17 = arith.constant dense<0.000000e+00> : vector<8x8xf32>
    %25 = tpu.matmul %24, %13, %cst_17 {dimension_numbers = #tpu.dot_dimension_numbers<[1], [0], [0], [1], [0, 0, 1, 1], [], []>} : vector<8x8xf32>, vector<8x8xf32>, vector<8x8xf32> -> vector<8x8xf32>
    %c0_18 = arith.constant 0 : index
    %c0_19 = arith.constant 0 : index
    %26 = vector.load %arg13[%c0_18, %c0_19] : memref<8x32xf32, #tpu.memory_space<vmem>>, vector<8x8xf32>
    tpu.vector_store %arg13[%c0_18, %c0_19], %25 {strides = array<i32>} : memref<8x32xf32, #tpu.memory_space<vmem>>, vector<8x8xf32>,
    %c0_20 = arith.constant 0 : index
    %c8 = arith.constant 8 : index
    %27 = vector.load %arg11[%c0_20, %c8] : memref<8x32xf32, #tpu.memory_space<vmem>>, vector<8x8xf32>
    %c0_21 = arith.constant 0 : index
    %c8_22 = arith.constant 8 : index
    %28 = vector.load %arg12[%c0_21, %c8_22] : memref<8x64xf32, #tpu.memory_space<vmem>>, vector<8x8xf32>
    %c0_23 = arith.constant 0 : index
    %c40 = arith.constant 40 : index
    %29 = vector.load %arg12[%c0_23, %c40] : memref<8x64xf32, #tpu.memory_space<vmem>>, vector<8x8xf32>
    %cst_24 = arith.constant dense<0.000000e+00> : vector<8x8xf32>
    %30 = tpu.matmul %27, %28, %cst_24 {dimension_numbers = #tpu.dot_dimension_numbers<[1], [1], [0], [0], [0, 0, 1, 0], [], []>} : vector<8x8xf32>, vector<8x8xf32>, vector<8x8xf32> -> vector<8x8xf32>
    %cst_25 = arith.constant dense<0xFF800000> : vector<8xf32>
    %31 = vector.multi_reduction <maximumf>, %30, %cst_25 [1] : vector<8x8xf32> to vector<8xf32>
    %32 = vector.shape_cast %31 : vector<8xf32> to vector<8x1xf32>
    %33 = vector.broadcast %32 : vector<8x1xf32> to vector<8x8xf32>
    %34 = arith.subf %30, %33 : vector<8x8xf32>
    %35 = math.exp %34 : vector<8x8xf32>
    %cst_26 = arith.constant dense<0.000000e+00> : vector<8xf32>
    %36 = vector.multi_reduction <add>, %35, %cst_26 [1] : vector<8x8xf32> to vector<8xf32>
    %37 = vector.shape_cast %36 : vector<8xf32> to vector<8x1xf32>
    %38 = tpu.reciprocal %37 {approx = true} : vector<8x1xf32> -> vector<8x1xf32>
    %39 = vector.broadcast %38 : vector<8x1xf32> to vector<8x8xf32>
    %40 = arith.mulf %35, %39 : vector<8x8xf32>
    %cst_27 = arith.constant dense<0.000000e+00> : vector<8x8xf32>
    %41 = tpu.matmul %40, %29, %cst_27 {dimension_numbers = #tpu.dot_dimension_numbers<[1], [0], [0], [1], [0, 0, 1, 1], [], []>} : vector<8x8xf32>, vector<8x8xf32>, vector<8x8xf32> -> vector<8x8xf32>
    %c0_28 = arith.constant 0 : index
    %c8_29 = arith.constant 8 : index
    %42 = vector.load %arg13[%c0_28, %c8_29] : memref<8x32xf32, #tpu.memory_space<vmem>>, vector<8x8xf32>
    tpu.vector_store %arg13[%c0_28, %c8_29], %41 {strides = array<i32>} : memref<8x32xf32, #tpu.memory_space<vmem>>, vector<8x8xf32>,
    %c0_30 = arith.constant 0 : index
    %c16 = arith.constant 16 : index
    %43 = vector.load %arg11[%c0_30, %c16] : memref<8x32xf32, #tpu.memory_space<vmem>>, vector<8x8xf32>
    %c0_31 = arith.constant 0 : index
    %c16_32 = arith.constant 16 : index
    %44 = vector.load %arg12[%c0_31, %c16_32] : memref<8x64xf32, #tpu.memory_space<vmem>>, vector<8x8xf32>
    %c0_33 = arith.constant 0 : index
    %c48 = arith.constant 48 : index
    %45 = vector.load %arg12[%c0_33, %c48] : memref<8x64xf32, #tpu.memory_space<vmem>>, vector<8x8xf32>
    %cst_34 = arith.constant dense<0.000000e+00> : vector<8x8xf32>
    %46 = tpu.matmul %43, %44, %cst_34 {dimension_numbers = #tpu.dot_dimension_numbers<[1], [1], [0], [0], [0, 0, 1, 0], [], []>} : vector<8x8xf32>, vector<8x8xf32>, vector<8x8xf32> -> vector<8x8xf32>
    %cst_35 = arith.constant dense<0xFF800000> : vector<8xf32>
    %47 = vector.multi_reduction <maximumf>, %46, %cst_35 [1] : vector<8x8xf32> to vector<8xf32>
    %48 = vector.shape_cast %47 : vector<8xf32> to vector<8x1xf32>
    %49 = vector.broadcast %48 : vector<8x1xf32> to vector<8x8xf32>
    %50 = arith.subf %46, %49 : vector<8x8xf32>
    %51 = math.exp %50 : vector<8x8xf32>
    %cst_36 = arith.constant dense<0.000000e+00> : vector<8xf32>
    %52 = vector.multi_reduction <add>, %51, %cst_36 [1] : vector<8x8xf32> to vector<8xf32>
    %53 = vector.shape_cast %52 : vector<8xf32> to vector<8x1xf32>
    %54 = tpu.reciprocal %53 {approx = true} : vector<8x1xf32> -> vector<8x1xf32>
    %55 = vector.broadcast %54 : vector<8x1xf32> to vector<8x8xf32>
    %56 = arith.mulf %51, %55 : vector<8x8xf32>
    %cst_37 = arith.constant dense<0.000000e+00> : vector<8x8xf32>
    %57 = tpu.matmul %56, %45, %cst_37 {dimension_numbers = #tpu.dot_dimension_numbers<[1], [0], [0], [1], [0, 0, 1, 1], [], []>} : vector<8x8xf32>, vector<8x8xf32>, vector<8x8xf32> -> vector<8x8xf32>
    %c0_38 = arith.constant 0 : index
    %c16_39 = arith.constant 16 : index
    %58 = vector.load %arg13[%c0_38, %c16_39] : memref<8x32xf32, #tpu.memory_space<vmem>>, vector<8x8xf32>
    tpu.vector_store %arg13[%c0_38, %c16_39], %57 {strides = array<i32>} : memref<8x32xf32, #tpu.memory_space<vmem>>, vector<8x8xf32>,
    %c0_40 = arith.constant 0 : index
    %c24 = arith.constant 24 : index
    %59 = vector.load %arg11[%c0_40, %c24] : memref<8x32xf32, #tpu.memory_space<vmem>>, vector<8x8xf32>
    %c0_41 = arith.constant 0 : index
    %c24_42 = arith.constant 24 : index
    %60 = vector.load %arg12[%c0_41, %c24_42] : memref<8x64xf32, #tpu.memory_space<vmem>>, vector<8x8xf32>
    %c0_43 = arith.constant 0 : index
    %c56 = arith.constant 56 : index
    %61 = vector.load %arg12[%c0_43, %c56] : memref<8x64xf32, #tpu.memory_space<vmem>>, vector<8x8xf32>
    %cst_44 = arith.constant dense<0.000000e+00> : vector<8x8xf32>
    %62 = tpu.matmul %59, %60, %cst_44 {dimension_numbers = #tpu.dot_dimension_numbers<[1], [1], [0], [0], [0, 0, 1, 0], [], []>} : vector<8x8xf32>, vector<8x8xf32>, vector<8x8xf32> -> vector<8x8xf32>
    %cst_45 = arith.constant dense<0xFF800000> : vector<8xf32>
    %63 = vector.multi_reduction <maximumf>, %62, %cst_45 [1] : vector<8x8xf32> to vector<8xf32>
    %64 = vector.shape_cast %63 : vector<8xf32> to vector<8x1xf32>
    %65 = vector.broadcast %64 : vector<8x1xf32> to vector<8x8xf32>
    %66 = arith.subf %62, %65 : vector<8x8xf32>
    %67 = math.exp %66 : vector<8x8xf32>
    %cst_46 = arith.constant dense<0.000000e+00> : vector<8xf32>
    %68 = vector.multi_reduction <add>, %67, %cst_46 [1] : vector<8x8xf32> to vector<8xf32>
    %69 = vector.shape_cast %68 : vector<8xf32> to vector<8x1xf32>
    %70 = tpu.reciprocal %69 {approx = true} : vector<8x1xf32> -> vector<8x1xf32>
    %71 = vector.broadcast %70 : vector<8x1xf32> to vector<8x8xf32>
    %72 = arith.mulf %67, %71 : vector<8x8xf32>
    %cst_47 = arith.constant dense<0.000000e+00> : vector<8x8xf32>
    %73 = tpu.matmul %72, %61, %cst_47 {dimension_numbers = #tpu.dot_dimension_numbers<[1], [0], [0], [1], [0, 0, 1, 1], [], []>} : vector<8x8xf32>, vector<8x8xf32>, vector<8x8xf32> -> vector<8x8xf32>
    %c0_48 = arith.constant 0 : index
    %c24_49 = arith.constant 24 : index
    %74 = vector.load %arg13[%c0_48, %c24_49] : memref<8x32xf32, #tpu.memory_space<vmem>>, vector<8x8xf32>
    tpu.vector_store %arg13[%c0_48, %c24_49], %73 {strides = array<i32>} : memref<8x32xf32, #tpu.memory_space<vmem>>, vector<8x8xf32>,
    %c0_50 = arith.constant 0 : index
    %c0_51 = arith.constant 0 : index
    %75 = vector.load %arg13[%c0_50, %c0_51] : memref<8x32xf32, #tpu.memory_space<vmem>>, vector<8x32xf32>
    %c0_52 = arith.constant 0 : index
    %c0_53 = arith.constant 0 : index
    %76 = vector.load %arg8[%c0_52, %c0_53] : memref<32x32xf32, #tpu.memory_space<vmem>>, vector<32x32xf32>
    %cst_54 = arith.constant dense<0.000000e+00> : vector<8x32xf32>
    %77 = tpu.matmul %75, %76, %cst_54 {dimension_numbers = #tpu.dot_dimension_numbers<[1], [0], [0], [1], [0, 0, 1, 1], [], []>} : vector<8x32xf32>, vector<32x32xf32>, vector<8x32xf32> -> vector<8x32xf32>
    %c0_55 = arith.constant 0 : index
    %c0_56 = arith.constant 0 : index
    %78 = vector.load %arg9[%c0_55, %c0_56] : memref<1x32xf32, #tpu.memory_space<vmem>>, vector<1x32xf32>
    %79 = vector.broadcast %78 : vector<1x32xf32> to vector<8x32xf32>
    %80 = arith.addf %77, %79 : vector<8x32xf32>
    %c0_57 = arith.constant 0 : index
    %c0_58 = arith.constant 0 : index
    %c0_59 = arith.constant 0 : index
    %81 = vector.load %arg10[%c0_57, %c0_58, %c0_59] : memref<1x8x32xf32, #tpu.memory_space<vmem>>, vector<1x8x32xf32>
    %82 = vector.shape_cast %81 : vector<1x8x32xf32> to vector<8x32xf32>
    %83 = vector.shape_cast %80 : vector<8x32xf32> to vector<1x8x32xf32>
    tpu.vector_store %arg10[%c0_57, %c0_58, %c0_59], %83 {strides = array<i32>} : memref<1x8x32xf32, #tpu.memory_space<vmem>>, vector<1x8x32xf32>,
    return
  }
  func.func @transform_0(%arg0: i32, %arg1: i32) -> (i32, i32, i32) {
    %c0_i32 = arith.constant 0 : i32
    %c0_i32_0 = arith.constant 0 : i32
    return %arg0, %arg1, %c0_i32 : i32, i32, i32
  }
  func.func @transform_1(%arg0: i32, %arg1: i32) -> (i32, i32, i32) {
    %c0_i32 = arith.constant 0 : i32
    %c0_i32_0 = arith.constant 0 : i32
    %c0_i32_1 = arith.constant 0 : i32
    return %arg0, %c0_i32, %c0_i32_0 : i32, i32, i32
  }
  func.func @transform_2(%arg0: i32, %arg1: i32) -> (i32, i32) {
    %c0_i32 = arith.constant 0 : i32
    %c0_i32_0 = arith.constant 0 : i32
    %c0_i32_1 = arith.constant 0 : i32
    return %c0_i32, %c0_i32_0 : i32, i32
  }
  func.func @transform_3(%arg0: i32, %arg1: i32) -> (i32, i32) {
    %c0_i32 = arith.constant 0 : i32
    %c0_i32_0 = arith.constant 0 : i32
    %c0_i32_1 = arith.constant 0 : i32
    return %c0_i32, %c0_i32_0 : i32, i32
  }
  func.func @transform_4(%arg0: i32, %arg1: i32) -> (i32, i32) {
    %c0_i32 = arith.constant 0 : i32
    %c0_i32_0 = arith.constant 0 : i32
    %c0_i32_1 = arith.constant 0 : i32
    return %c0_i32, %c0_i32_0 : i32, i32
  }
  func.func @transform_5(%arg0: i32, %arg1: i32) -> (i32, i32) {
    %c0_i32 = arith.constant 0 : i32
    %c0_i32_0 = arith.constant 0 : i32
    %c0_i32_1 = arith.constant 0 : i32
    return %c0_i32, %c0_i32_0 : i32, i32
  }
  func.func @transform_6(%arg0: i32, %arg1: i32) -> (i32, i32) {
    %c0_i32 = arith.constant 0 : i32
    %c0_i32_0 = arith.constant 0 : i32
    %c0_i32_1 = arith.constant 0 : i32
    return %c0_i32, %c0_i32_0 : i32, i32
  }
  func.func @transform_7(%arg0: i32, %arg1: i32) -> (i32, i32) {
    %c0_i32 = arith.constant 0 : i32
    %c0_i32_0 = arith.constant 0 : i32
    %c0_i32_1 = arith.constant 0 : i32
    return %c0_i32, %c0_i32_0 : i32, i32
  }
  func.func @transform_8(%arg0: i32, %arg1: i32) -> (i32, i32, i32) {
    %c0_i32 = arith.constant 0 : i32
    %c0_i32_0 = arith.constant 0 : i32
    return %arg0, %arg1, %c0_i32 : i32, i32, i32
  }
}

</mosaic_0001>

<bundles_post_ra>
// kernel: tpu_custom_call.1
= control target key start
LH: loop header
LB: loop body
LE: loop exit
PB: predicated region body
PF: predicated region fallthrough
CT: control target
= control target key end

     0   :  { %s1665_s0 = inlined_call_operand.hbm [shape: f32[2,8,32], index: 0, kind: input, shape index: {}]   ;;  %s1666_s1 = inlined_call_operand.hbm [shape: f32[2,8,16], index: 1, kind: input, shape index: {}]   ;;  %s1667_s2 = inlined_call_operand.hbm [shape: f32[32,32], index: 2, kind: input, shape index: {}]   ;;  %s1668_s3 = inlined_call_operand.vmem [shape: f32[1,32], index: 3, kind: input, shape index: {}]   ;;  %s1669_s4 = inlined_call_operand.hbm [shape: f32[16,64], index: 4, kind: input, shape index: {}]   ;;  %s1670_s5 = inlined_call_operand.vmem [shape: f32[1,64], index: 5, kind: input, shape index: {}]   ;;  %s1671_s6 = inlined_call_operand.hbm [shape: f32[32,32], index: 6, kind: input, shape index: {}]   ;;  %s1672_s7 = inlined_call_operand.vmem [shape: f32[1,32], index: 7, kind: input, shape index: {}]   ;;  %s1673_s8 = inlined_call_operand.hbm [shape: f32[2,8,32], index: 8, kind: output, shape index: {}]  }
   0x1   :  { %1679 = sst [smem:[#allocation26_spill]] %s1667_s2 }
   0x2   :  { %1680 = sst [smem:[#allocation27_spill]] %s1669_s4 }
   0x3   :  { %1681 = sst [smem:[#allocation28_spill]] %s1671_s6 }
   0x4   :  { %13 = vsyncpa [#allocation6], 0 }
   0x5   :  { %15 = vsyncpa [#allocation6 + $0x1], 0 }
   0x6   :  { %16 = vsyncpa [#allocation9], 0 }
   0x7   :  { %18 = vsyncpa [#allocation9 + $0x1], 0 }
   0x8   :  { %19 = vsyncpa [#allocation12], 0 }
   0x9   :  { %20 = vsyncpa [#allocation7], 0 }
   0xa   :  { %22 = vsyncpa [#allocation7 + $0x1], 0  ;;  %s1444_s27 = smov 0   ;;  %s1446_s28 = smov 0  }
   0xb   :  { %s1448_s29 = smov 0   ;;  %s1450_s30 = smov 0  }
   0xc   :  { %s1452_s9 = smov 0   ;;  %s1454_s10 = smov 0  }
   0xd LB: > { %1682 = sst [smem:[#allocation20_spill]] %s1362_s27  ;;  %s1475_s11 = sadd.s32 4294967295, %s1382_s10   ;;  %s1382_s10 = sphi %s1454_s10, %s28_s10   ;;  %s1378_s9 = sphi %s1452_s9, %s1702_s9   ;;  %s1374_s30 = sphi %s1450_s30, %s1701_s30   ;;  %s1370_s29 = sphi %s1448_s29, %s1700_s29   ;;  %s1366_s28 = sphi %s1446_s28, %s1704_s28   ;;  %s1362_s27 = sphi %s1444_s27, %s1703_s27  }
   0xe   : > { %1683 = sst [smem:[#allocation21_spill]] %s1370_s29  ;;  %p974_p0 = scmp.ge.s32.totalorder %s1382_s10, 1 }
   0xf   : > { %1684 = sst [smem:[#allocation22_spill]] %s1378_s9  ;;  %p63_p1 = scmp.eq.s32.totalorder %s1475_s11, 0 }
  0x10   : > { %p253_p2 = scmp.lt.s32.totalorder %s1382_s10, 3  ;;  %s1685_s2 = sld [smem:[#allocation26_spill]] }
  0x11   : > { %s1384_s16 = smov [#allocation10]   ;;  %p978_p6 = scmp.ge.s32.totalorder %s1382_s10, 2 }
  0x12   : > { %p1483_p3 = pnand %p974_p0, %p253_p2  ;;  %s266_s17 = sshll.u32 %s1384_s16, 4  ;;  %s267_s17 = int_to_ptr.vmem [resolvable:$true] %s266_s17 }
  0x13   : > { %s1688_s4 = sld [smem:[#allocation27_spill]]  ;;  %s1385_s22 = smov 128  }
  0x14   : > { %p1027_p4 = pneg %p1483_p3  ;;  %s1386_s23 = smov 8  }
  0x15   : > { %s1387_s24 = smov [#allocation11]   ;;  %s1689_s6 = sld [smem:[#allocation28_spill]] }
  0x16   : > { %s264_s14 = sshll.u32 %s1685_s2, 4  ;;  %p1491_p5 = pnand %p1027_p4, %p63_p1  ;;  %s265_s14 = int_to_ptr.hbm [resolvable:$true] %s264_s14 }
  0x17   : > { %s283_s25 = sshll.u32 %s1387_s24, 4  ;;  %s1388_s16 = smov [#allocation13]   ;;  %s284_s25 = int_to_ptr.vmem [resolvable:$true] %s283_s25 }
  0x18   : > { %1030 = dma.hbm_to_vmem [thread:$0]  (!%p1491_p5), %s265_s14, 512, %s267_s17, [#allocation9], %s1385_s22, %s1385_s22, %s1386_s23  }
  0x19   : > { %s281_s21 = sshll.u32 %s1688_s4, 4  ;;  %s300_s19 = sshll.u32 %s1388_s16, 4  ;;  %s282_s21 = int_to_ptr.hbm [resolvable:$true] %s281_s21  ;;  %s301_s19 = int_to_ptr.vmem [resolvable:$true] %s300_s19 }
  0x1a   : > { %1033 = dma.hbm_to_vmem [thread:$0]  (!%p1491_p5), %s282_s21, 256, %s284_s25, [#allocation12], %s1385_s22, %s1385_s22, %s1386_s23  }
  0x1b   : > { %s298_s13 = sshll.u32 %s1689_s6, 4  ;;  %s973_s14 = sadd.s32 4294967294, %s1382_s10   ;;  %s299_s13 = int_to_ptr.hbm [resolvable:$true] %s298_s13 }
  0x1c   : > { %1036 = dma.hbm_to_vmem [thread:$0]  (!%p1491_p5), %s299_s13, 512, %s301_s19, [#allocation12], %s1385_s22, %s1385_s22, %s1386_s23  }
  0x1d   : > { %s40_s17 = sadd.s32 1, %s1378_s9  ;;  %s49_s20 = sadd.s32 1, %s1370_s29 }
  0x1e   : > { %p42_p7 = scmp.ge.s32.totalorder %s40_s17, 2  ;;  %p56_p8 = scmp.ne.s32.totalorder %s1370_s29, %s1366_s28 }
  0x1f   : > { %p57_p9 = scmp.eq.s32.totalorder %s1382_s10, 0  ;;  %p62_p10 = scmp.ne.s32.totalorder %s1366_s28, %s1362_s27 }
  0x20   : > { %s1706_s17 = smov (%p42_p7, %s40_s17), 0  ;;  %p240_p13 = scmp.eq.s32.totalorder %s1475_s11, 1 }
  0x21   : > { %1690 = sst [smem:[#allocation23_spill]] %s1706_s17  ;;  %p1518_p11 = por %p57_p9, %p56_p8 }
  0x22   : > { %p1524_p12 = por %p63_p1, %p62_p10  ;;  %s44_s22 = ssub.s32 %s1378_s9, %s1706_s17 }
  0x23   : > { %p47_p0 = scmp.eq.s32.totalorder %s44_s22, 0  ;;  %p246_p2 = scmp.eq.s32.totalorder %s973_s14, 1 }
  0x24   : > { %p1531_p4 = por %p240_p13, %p56_p8  ;;  %p1051_p5 = scmp.lt.s32.totalorder %s1382_s10, 2 }
  0x25   : > { %s1537_s24 = scalar_select %p47_p0, %s1370_s29, %s49_s20  }
  0x26   : > { %p1539_p7 = por %p246_p2, %p62_p10  ;;  %s317_s26 = sand.u32 1, %s1370_s29  }
  0x27   : > { %1694 = sst [smem:[#allocation24_spill]] %s1537_s24  ;;  %s979_s12 = sshll.u32 %s317_s26, 3 }
  0x28   : > { %s1695_s25 = scalar_select %p1539_p7, 1, 0 }
  0x29   : > { %s980_s13 = sshll.u32 %s1378_s9, 3  ;;  %s321_s14 = scalar_lea.vmem [#allocation5], %s979_s12 }
  0x2a   : > { %1696 = sst [smem:[#allocation25_spill]] %s1695_s25  ;;  %s326_s22 = scalar_lea.hbm %s1665_s0, %s980_s13 }
  0x2b   : > { %s330_s2 = sshll.u32 %s321_s14, 4  ;;  %s328_s4 = sshll.u32 %s326_s22, 4  ;;  %s331_s2 = int_to_ptr.vmem [resolvable:$true] %s330_s2  ;;  %s329_s4 = int_to_ptr.hbm [resolvable:$true] %s328_s4 }
  0x2c   : > { %p1038_p8 = pnand %p1051_p5, %p1518_p11  ;;  %s345_s17 = scalar_lea.hbm %s1666_s1, %s980_s13 }
  0x2d   : > { %s337_s24 = sand.u32 1, %s1382_s10   ;;  %s318_s25 = scalar_lea.sflag [#allocation6], %s317_s26 }
  0x2e   : > { %1040 = dma.hbm_to_vmem [thread:$0]  (!%p1038_p8), %s329_s4, 128, %s331_s2, %s318_s25  }
  0x2f   : > { %s347_s29 = sshll.u32 %s345_s17, 4  ;;  %s341_s9 = scalar_lea.vmem [#allocation8], %s979_s12  ;;  %s348_s29 = int_to_ptr.hbm [resolvable:$true] %s347_s29 }
  0x30   : > { %s349_s27 = sshll.u32 %s341_s9, 4  ;;  %s338_s16 = scalar_lea.sflag [#allocation9], %s337_s24  ;;  %s350_s27 = int_to_ptr.vmem [resolvable:$true] %s349_s27 }
  0x31   : > { %1043 = dma.hbm_to_vmem [thread:$0]  (!%p1038_p8), %s348_s29, 128, %s350_s27, %s338_s16  }
  0x32   : > { %358 = sbr.rel (%p1483_p3) target bundleno = 1375 (0x55f), region = 52  ;;  %s1557_s21 = sand.u32 (!%p1483_p3), 1, %s1366_s28  }
  0x33   : > { %s1560_s6 = sshll.u32 (!%p1483_p3), %s1557_s21, 3  ;;  %s361_s2 = scalar_lea.sflag (!%p1483_p3), [#allocation6], %s1557_s21 }
  0x34   : > { %s364_s4 = scalar_lea.vmem (!%p1483_p3), [#allocation5], %s1560_s6 }
  0x37   : > { %1341 = dma.done.wait (%p1524_p12), %s361_s2, 128  }
  0x38   : > { %1343 = vsyncadd (%p1524_p12), %s361_s2, 4294967168  ;;  %s370_s27 = sand.u32 1, %s1475_s11   ;;  %s374_s9 = scalar_lea.vmem [#allocation8], %s1560_s6 }
  0x39   : > { %s371_s29 = scalar_lea.sflag [#allocation9], %s370_s27 }
  0x3a   : > { %1345 = dma.done.wait (%p1524_p12), %s371_s29, 128  }
  0x3b   : > { %1347 = vsyncadd (%p1524_p12), %s371_s29, 4294967168 }
  0x3c   : > { %1349 = dma.done.wait (%p63_p1), [#allocation9], 512  }
  0x3d   : > { %1351 = vsyncadd (%p63_p1), [#allocation9], 4294966784 }
  0x3e   : > { %1353 = dma.done.wait (%p63_p1), [#allocation12], 768  }
  0x3f   : > { %1355 = vsyncadd (%p63_p1), [#allocation12], 4294966528  ;;  %v434_v0 = vld [vmem:[#allocation11 + $0x8] sm:$0xff]  ;;  %v469_v1 = vld [vmem:[#allocation10 + $0x18] sm:$0xff]  ;;  %vm439_vm0 = vcmask 130048   ;;  %vm474_vm1 = vcmask 261120  }
  0x40   : > { %v433_v2 = vld [vmem:[#allocation11] sm:$0xff]  ;;  %457 = vmatpush.msra.mxu0 %v434_v0  ;;  %490 = vmatpush.msra.mxu1 %v469_v1  ;;  %v468_v3 = vld [vmem:[#allocation10 + $0x10] sm:$0xff]  ;;  %v467_v5 = vld [vmem:[#allocation10 + $0x8] sm:$0xff]  ;;  %vm463_vm2 = vcmask 523264   ;;  %vm501_vm3 = vcmask 64512   ;;  %s1389_s24 = smov 96  }
  0x41   : > { %v432_v4 = vld [vmem:[%s374_s9] sm:$0xff]  ;;  %v466_v6 = vld [vmem:[#allocation10] sm:$0xff]  ;;  %v1119_v8 = vld [vmem:[%s1670_s5] ss:$0 sm:$0xff]  ;;  %s1390_s25 = smov 120   ;;  %s1391_s26 = smov 112  }
  0x42   : > { %458 = vmatpush.msra.mxu0 %v433_v2  ;;  %491 = vmatpush.msra.mxu1 %v468_v3  ;;  %v465_v7 = vld [vmem:[%s364_s4] sm:$0xff]  ;;  %s1392_s12 = smov 104   ;;  %s1393_s13 = smov 80   ;;  %vm639_vm4 = vcmask 130112   ;;  %vm714_vm5 = vcmask 195712   ;;  %vm789_vm6 = vcmask 261312  }
  0x43   : > { %990 = vmatmul.msk.f32.vlgmr.msra.gmra.mxu0 %vm439_vm0, %v432_v4  ;;  %v1120_v11 = vld [vmem:[%s1668_s3] ss:$0 sm:$0xff]  ;;  %s1394_s19 = smov 88   ;;  %s1395_s22 = smov 72  }
  0x44   : > { %492 = vmatpush.msra.mxu1 %v467_v5  ;;  %s1396_s14 = smov 16   ;;  %s1397_s20 = smov 8  }
  0x45   : > { %s1398_s16 = smov 24   ;;  %s1006_s2 = sshll.u32 %s1374_s30, 3 }
  0x46   : > { %493 = vmatpush.msra.mxu1 %v466_v6  ;;  %v795_v6 = vld [vmem:[#allocation13 + $0x18] sm:$0xff]  ;;  %s836_s29 = scalar_lea.hbm %s1673_s8, %s1006_s2  ;;  %s427_s15 = scalar_lea.vmem [#allocation14], %s1560_s6 }
  0x47   : > { %991 = vmatmul.msk.f32.vlgmr.msra.gmra.mxu1 %vm474_vm1, %v465_v7  ;;  %v794_v7 = vld [vmem:[#allocation13 + $0x10] sm:$0xff]  ;;  %s838_s17 = sshll.u32 %s427_s15, 4  ;;  %s840_s18 = sshll.u32 %s836_s29, 4  ;;  %s839_s17 = int_to_ptr.vmem [resolvable:$true] %s838_s17  ;;  %s841_s18 = int_to_ptr.hbm [resolvable:$true] %s840_s18 }
  0x48   : > { %s1302_s30 = sshra.s32 %s841_s18, 4  ;;  %s1308_s6 = scalar_lea.hbm %s1673_s8, 16  ;;  %s1303_s30 = int_to_ptr.hbm [resolvable:$true] %s1302_s30 }
  0x49   : > { %p1309_p10 = scmp.lt.s32.totalorder %s1303_s30, %s1673_s8 }
  0xc0   : > { %v460_v9 = vpop.f32.mrf.mxu0 }
  0xc1   : > { %v461_v10 = vadd.f32 %v1119_v8, %v460_v9  ;;  %v793_v8 = vld [vmem:[#allocation13 + $0x8] sm:$0xff]  ;;  %v792_v9 = vld [vmem:[#allocation13] sm:$0xff] }
  0xc3   : > { %464 = vst.msk [vmem:[#allocation3] sm:$0xff] %vm463_vm2, %v461_v10 }
  0xc4   : > { %v495_v12 = vpop.f32.mrf.mxu1 }
  0xc5   : > { %v496_v13 = vadd.f32 %v1120_v11, %v495_v12 }
  0xc7   : > { %498 = vst.msk [vmem:[#allocation2] sm:$0xff] %vm474_vm1, %v496_v13 }
  0xca   : > { %v1590_v14 = vld [vmem:[#allocation3] sm:$0xff] }
  0xcb   : > { %539 = vrot.lane.b32.xlu1 %v1590_v14, %s1389_s24  ;;  %992 = vmatpush.xpose.msk.msra.mxu2 %vm501_vm3, %v1590_v14  ;;  %s825_s24 = scalar_lea.sflag [#allocation7], %s1557_s21 }
  0xce   : > { %v566_v15 = vld [vmem:[#allocation2] sm:$0xff] }
  0xcf   : > { %569 = vrot.lane.b32.xlu2 %v566_v15, %s1390_s25  ;;  %993 = vmatmul.msk.f32.vlgmr.msra.gmra.mxu2 %vm501_vm3, %v566_v15 }
  0xd3   : > { %572 = vrot.lane.b32.xlu1 %v1590_v14, %s1390_s25  ;;  %s1304_s25 = scalar_lea.hbm %s1303_s30, 8 }
  0xd4   : > { %p1305_p1 = scmp.ne.s32.totalorder %s1303_s30, %s1304_s25  ;;  %p1310_p11 = scmp.lt.s32.totalorder %s1308_s6, %s1304_s25 }
  0xd6   : > { %p1306_p3 = pnand %p1305_p1, %p1531_p4  ;;  %p1311_p12 = por %p1310_p11, %p1309_p10 }
  0xd7   : > { %647 = vrot.lane.b32.xlu2 %v1590_v14, %s1391_s26 }
  0xd8   : > { %p1307_p9 = pneg %p1306_p3 }
  0xda   : > { %p1312_p13 = pnand %p1311_p12, %p1307_p9 }
  0xdb   : > { %644 = vrot.lane.b32.xlu1 %v566_v15, %s1391_s26 }
  0xdf   : > { %719 = vrot.lane.b32.xlu2 %v566_v15, %s1392_s12 }
 0x129   : > { %v570_v16 = vpop.permute.xlu2 %569 }
 0x131   : > { %v648_v17 = vpop.permute.xlu2 %647 }
 0x132   : > { %998 = vmatpush.xpose.msk.msrb.mxu2 %vm501_vm3, %v648_v17 }
 0x136   : > { %815 = vmatpush.msra.mxu2 %v795_v6 }
 0x138   : > { %816 = vmatpush.msra.mxu2 %v794_v7 }
 0x139   : > { %v720_v34 = vpop.permute.xlu2 %719 }
 0x13a   : > { %817 = vmatpush.msra.mxu2 %v793_v8 }
 0x13c   : > { %818 = vmatpush.msra.mxu2 %v792_v9 }
 0x13d   : > { %v540_v18 = vpop.permute.xlu1 %539 }
 0x13e   : > { %560 = vmatpush.msra.mxu3 %v540_v18 }
 0x145   : > { %v573_v19 = vpop.permute.xlu1 %572 }
 0x146   : > { %995 = vmatpush.xpose.msk.msrb.mxu3 %vm501_vm3, %v573_v19 }
 0x14d   : > { %v645_v20 = vpop.permute.xlu1 %644 }
 0x14e   : > { %999 = vmatmul.msk.f32.vlgmr.msrb.gmra.mxu2 %vm501_vm3, %v645_v20 }
 0x152   : > { %v525_v21 = vpop.f32.mrf.mxu2 }
 0x153   : > { %v528_v22 = vsel %vm501_vm3, %v525_v21, -inf }
 0x154   : > { %529 = vmax.xlane.f32.xlu0 %v528_v22 }
 0x1c7   : > { %v530_v23 = vpop.xlane.xlu0 %529 }
 0x1c8   : > { %v531_v24 = vsub.f32 %v525_v21, %v530_v23 }
 0x1ca   : > { %v532_v25 = vmul.f32 1.442695, %v531_v24 }
 0x1cc   : > { %1122 = vpow2.f32 %v532_v25 }
 0x1d1   : > { %v670_v26 = vpop.f32.mrf.mxu2 }
 0x1d2   : > { %v1123_v27 = vpop.eup %1122  ;;  %v673_v28 = vsel %vm501_vm3, %v670_v26, -inf }
 0x1d3   : > { %674 = vmax.xlane.f32.xlu2 %v673_v28  ;;  %v534_v29 = vsel %vm501_vm3, %v1123_v27, 0.0 }
 0x1d4   : > { %535 = vadd.xlane.f32.xlu0 %v534_v29 }
 0x1e8   : > { %722 = vrot.lane.b32.xlu0 %v1590_v14, %s1392_s12 }
 0x246   : > { %v675_v35 = vpop.xlane.xlu2 %674 }
 0x247   : > { %v536_v30 = vpop.xlane.xlu0 %535  ;;  %v676_v36 = vsub.f32 %v670_v26, %v675_v35 }
 0x248   : > { %1124 = vrcp.f32 %v536_v30 }
 0x249   : > { %v677_v38 = vmul.f32 1.442695, %v676_v36 }
 0x24b   : > { %1126 = vpow2.f32 %v677_v38 }
 0x24e   : > { %v1125_v31 = vpop.eup %1124 }
 0x24f   : > { %v538_v32 = vmul.f32 %v1125_v31, %v1123_v27 }
 0x251   : > { %994 = vmatmul.msk.f32.vlgmr.msra.gmra.mxu3 %vm501_vm3, %v538_v32  ;;  %v1127_v41 = vpop.eup %1126 }
 0x252   : > { %v679_v43 = vsel %vm501_vm3, %v1127_v41, 0.0 }
 0x259   : > { %996 = vmatmul.msk.f32.vlgmr.msrb.gmra.mxu3 %vm501_vm3, %v570_v16 }
 0x25a   : > { %v723_v33 = vpop.permute.xlu0 %722 }
 0x25b   : > { %1001 = vmatpush.xpose.msk.msra.mxu3 %vm501_vm3, %v723_v33 }
 0x261   : > { %1002 = vmatmul.msk.f32.vlgmr.msra.gmra.mxu3 %vm501_vm3, %v720_v34 }
 0x2d4   : > { %v562_v37 = vpop.f32.mrf.mxu3 }
 0x2d5   : > { %565 = vst.msk [vmem:[#allocation4] sm:$0xff] %vm501_vm3, %v562_v37 }
 0x2dc   : > { %v595_v39 = vpop.f32.mrf.mxu3 }
 0x2dd   : > { %v598_v40 = vsel %vm501_vm3, %v595_v39, -inf }
 0x2de   : > { %599 = vmax.xlane.f32.xlu1 %v598_v40 }
 0x2e4   : > { %v745_v42 = vpop.f32.mrf.mxu3 }
 0x2e5   : > { %v748_v44 = vsel %vm501_vm3, %v745_v42, -inf }
 0x2e6   : > { %680 = vadd.xlane.f32.xlu1 %v679_v43  ;;  %749 = vmax.xlane.f32.xlu0 %v748_v44 }
 0x2fa   : > { %684 = vrot.lane.b32.xlu0 %v1590_v14, %s1393_s13 }
 0x2ff   : > { %609 = vrot.lane.b32.xlu1 %v1590_v14, %s1394_s19 }
 0x351   : > { %v600_v45 = vpop.xlane.xlu1 %599 }
 0x352   : > { %v601_v46 = vsub.f32 %v595_v39, %v600_v45 }
 0x354   : > { %v602_v47 = vmul.f32 1.442695, %v601_v46 }
 0x356   : > { %1128 = vpow2.f32 %v602_v47 }
 0x359   : > { %v750_v48 = vpop.xlane.xlu0 %749  ;;  %v681_v53 = vpop.xlane.xlu1 %680 }
 0x35a   : > { %v751_v49 = vsub.f32 %v745_v42, %v750_v48 }
 0x35c   : > { %v1129_v50 = vpop.eup %1128  ;;  %v752_v51 = vmul.f32 1.442695, %v751_v49 }
 0x35d   : > { %v604_v52 = vsel %vm501_vm3, %v1129_v50, 0.0 }
 0x35e   : > { %1130 = vpow2.f32 %v752_v51  ;;  %605 = vadd.xlane.f32.xlu2 %v604_v52 }
 0x35f   : > { %1132 = vrcp.f32 %v681_v53 }
 0x364   : > { %v1131_v54 = vpop.eup %1130 }
 0x365   : > { %v754_v55 = vsel %vm501_vm3, %v1131_v54, 0.0  ;;  %v1133_v56 = vpop.eup %1132 }
 0x366   : > { %755 = vadd.xlane.f32.xlu2 %v754_v55  ;;  %v683_v58 = vmul.f32 %v1133_v56, %v1127_v41 }
 0x36c   : > { %v685_v57 = vpop.permute.xlu0 %684 }
 0x36d   : > { %705 = vmatpush.msrb.mxu1 %v685_v57 }
 0x36e   : > { %1000 = vmatmul.msk.f32.vlgmr.msrb.gmra.mxu1 %vm501_vm3, %v683_v58 }
 0x371   : > { %v610_v59 = vpop.permute.xlu1 %609 }
 0x372   : > { %630 = vmatpush.msrb.mxu0 %v610_v59 }
 0x37e   : > { %759 = vrot.lane.b32.xlu2 %v1590_v14, %s1395_s22  ;;  %v1121_v14 = vld [vmem:[%s1672_s7] ss:$0 sm:$0xff] }
 0x3d1   : > { %v606_v60 = vpop.xlane.xlu2 %605 }
 0x3d2   : > { %1134 = vrcp.f32 %v606_v60 }
 0x3d8   : > { %v1135_v61 = vpop.eup %1134 }
 0x3d9   : > { %v756_v62 = vpop.xlane.xlu2 %755  ;;  %v608_v63 = vmul.f32 %v1135_v61, %v1129_v50 }
 0x3da   : > { %1136 = vrcp.f32 %v756_v62 }
 0x3db   : > { %997 = vmatmul.msk.f32.vlgmr.msrb.gmra.mxu0 %vm501_vm3, %v608_v63 }
 0x3e0   : > { %v1137_v0 = vpop.eup %1136 }
 0x3e1   : > { %v758_v1 = vmul.f32 %v1137_v0, %v1131_v54  ;;  %v760_v2 = vpop.permute.xlu2 %759 }
 0x3e2   : > { %780 = vmatpush.msra.mxu0 %v760_v2 }
 0x3e3   : > { %1003 = vmatmul.msk.f32.vlgmr.msra.gmra.mxu0 %vm501_vm3, %v758_v1 }
 0x3eb   : > { %v707_v3 = vpop.f32.mrf.mxu1 }
 0x3ec   : > { %711 = vrot.lane.b32.xlu1 %v707_v3, %s1396_s14 }
 0x458   : > { %v632_v4 = vpop.f32.mrf.mxu0 }
 0x459   : > { %636 = vrot.lane.b32.xlu0 %v632_v4, %s1397_s20 }
 0x45e   : > { %v712_v11 = vpop.permute.xlu1 %711 }
 0x460   : > { %v782_v5 = vpop.f32.mrf.mxu0 }
 0x461   : > { %786 = vrot.lane.b32.xlu2 %v782_v5, %s1398_s16 }
 0x4bb   : > { %v787_v12 = vpop.permute.xlu2 %786 }
 0x4cb   : > { %v637_v10 = vpop.permute.xlu0 %636 }
 0x4cc   : > { %640 = vst.msk [vmem:[#allocation4] sm:$0xff] %vm639_vm4, %v637_v10 }
 0x4cd   : > { %715 = vst.msk [vmem:[#allocation4] sm:$0xff] %vm714_vm5, %v712_v11 }
 0x4ce   : > { %790 = vst.msk [vmem:[#allocation4] sm:$0xff] %vm789_vm6, %v787_v12 }
 0x4d5   : > { %v791_v13 = vld [vmem:[#allocation4] sm:$0xff] }
 0x4d6   : > { %1004 = vmatmul.msk.f32.vlgmr.msra.gmra.mxu2 %vm474_vm1, %v791_v13 }
 0x559   : > { %v820_v15 = vpop.f32.mrf.mxu2 }
 0x55a   : > { %v821_v16 = vadd.f32 %v1121_v14, %v820_v15 }
 0x55c   : > { %823 = vst.msk [vmem:[%s427_s15] sm:$0xff] %vm474_vm1, %v821_v16 }
 0x55d   : > { %1315 = shalt.err (!%p1312_p13)
}
 0x55e   : > { %1025 = dma.vmem_to_hbm [thread:$0]  (%p1531_p4), %s839_s17, 128, %s841_s18, %s825_s24  }
 0x55f PF: > { %s1697_s21 = sld [smem:[#allocation20_spill]]  ;;  %p1045_p0 = pnand %p978_p6, %p1539_p7 }
 0x561   : > { %p1046_p2 = pneg %p1045_p0 }
 0x565   : > { %s852_s14 = sand.u32 1, %s1697_s21  }
 0x566   : > { %s853_s20 = scalar_lea.sflag [#allocation7], %s852_s14 }
 0x567   : > { %1357 = dma.done.wait (%p1046_p2), %s853_s20, 128  }
 0x568   : > { %1359 = vsyncadd (%p1046_p2), %s853_s20, 4294967168  ;;  %s28_s10 = sadd.s32 1, %s1382_s10   ;;  %s1699_s16 = sld [smem:[#allocation21_spill]] }
 0x569   : > { %p25_p5 = scmp.ge.s32.totalorder %s28_s10, 4   ;;  %s1700_s29 = sld [smem:[#allocation24_spill]] }
 0x56a   : > { %s1701_s30 = sld [smem:[#allocation22_spill]]  ;;  %s1703_s27 = smov %s1366_s28 }
 0x56b   : > { %s1702_s9 = sld [smem:[#allocation23_spill]]  ;;  %27 = sbr.rel (!%p25_p5) target bundleno = 13 (0xd), region = 126 }
 0x56e   : > { %s1704_s28 = smov %s1699_s16 }
 0x570   :  { %859 = vsyncpa [#allocation6], 1 }
 0x571   :  { %861 = vsyncpa [#allocation6 + $0x1], 1 }
 0x572   :  { %862 = vsyncpa [#allocation9], 1 }
 0x573   :  { %864 = vsyncpa [#allocation9 + $0x1], 1 }
 0x574   :  { %865 = vsyncpa [#allocation12], 1 }
 0x575   :  { %866 = vsyncpa [#allocation7], 1 }
 0x576   :  { %868 = vsyncpa [#allocation7 + $0x1], 1 }

</bundles_post_ra>
